<compile_context>
chip_gen: v7x
topology: tpu7x:2x2x1
jax: 0.10.0
libtpu: 0.0.40
codegen_flags: <defaults>
</compile_context>

<pallas_src>
import functools

import jax
import jax.numpy as jnp
from jax import lax
from jax.experimental import pallas as pl
from jax.experimental.pallas import tpu as pltpu


def _conv2dzeros_kernel(x_ref, w_ref, b_ref, m_ref, o_ref, xp_ref, acc_ref,
                        *, H, W, Cin, Cout, KH, KW, ph, pw):
    """One grid step = one batch element.

    x_ref   : (1, Cin, H*W)          flat NCHW activation tile (VMEM)
    w_ref   : (KH*KW, Cout, Cin)     scale-folded weights, tap-major (VMEM, resident)
    b_ref   : (Cout, 1)              scale-folded bias (VMEM, resident)
    m_ref   : (KH*KW, 1, H*W)        per-tap validity masks (VMEM, resident)
    o_ref   : (1, Cout, H*W)         flat NCHW output tile (VMEM), lane axis = H*W
    xp_ref  : (Cin, H*W + 2*base)    zero-padded flat input scratch (VMEM)
    acc_ref : (Cout, H*W)            f32 accumulator scratch (VMEM)
    """
    HW = H * W
    base = ph * W + pw                     # halo width in flattened-spatial elements
    dt = xp_ref.dtype

    # Build the zero-padded flat input in VMEM (halo handled here, not in the wrapper).
    xp_ref[:, :base] = jnp.zeros((Cin, base), dt)
    xp_ref[:, base + HW:] = jnp.zeros((Cin, base), dt)
    xp_ref[:, base:base + HW] = x_ref[0]

    acc_ref[...] = jnp.zeros((Cout, HW), jnp.float32)

    # KH*KW taps: contiguous lane-slice + validity mask + one MXU matmul each,
    # accumulated into the f32 VMEM scratch.
    for kh in range(KH):
        for kw in range(KW):
            t = kh * KW + kw
            s = (kh - ph) * W + (kw - pw)                       # flat shift of this tap
            window = xp_ref[:, base + s: base + s + HW] * m_ref[t]   # (Cin, HW)
            acc_ref[...] += jnp.dot(w_ref[t], window,
                                    preferred_element_type=jnp.float32)

    # Scale is folded into w/b, so this is the final result.
    o_ref[0] = (acc_ref[...] + b_ref[...]).astype(o_ref.dtype)


def conv2d_zeros_pallas(x_nchw, weight_oihw, bias, logs, logscale_factor=3):
    """Pallas implementation of Conv2dZeros.forward.

    x_nchw      : (N, Cin, H, W)       float32
    weight_oihw : (Cout, Cin, KH, KW)  float32  (PyTorch layout)
    bias        : (Cout,)              float32
    logs        : (Cout, 1, 1)         float32
    returns     : (N, Cout, H, W)      float32  (matches PyTorch output)
    """
    N, Cin, H, W = x_nchw.shape
    Cout, _, KH, KW = weight_oihw.shape
    # compute_same_pad with stride=1; even kernels would need asymmetric padding.
    assert KH % 2 == 1 and KW % 2 == 1, "even kernel sizes need asymmetric 'same' padding"
    ph, pw = ((KH - 1) * 1 + 1) // 2, ((KW - 1) * 1 + 1) // 2
    HW = H * W
    base = ph * W + pw
    HWp = HW + 2 * base
    dtype = x_nchw.dtype

    # ---- tiny wrapper-side transforms (weights/bias/masks only; no activation pass) ----
    scale = jnp.exp(logs.reshape(Cout).astype(jnp.float32) * logscale_factor)   # (Cout,)
    # tap-major weights, scale folded in: w2[t=kh*KW+kw, co, ci] = W[co,ci,kh,kw]*scale[co]
    w2 = (jnp.transpose(weight_oihw, (2, 3, 0, 1)).reshape(KH * KW, Cout, Cin)
          * scale[None, :, None]).astype(jnp.float32)
    b2 = (bias.astype(jnp.float32) * scale).reshape(Cout, 1)

    # Per-tap validity mask: 1 where the tap's source pixel lies inside the image.
    oh = jnp.arange(H)[:, None]
    ow = jnp.arange(W)[None, :]
    mask_list = []
    for kh in range(KH):
        for kw in range(KW):
            dh, dw = kh - ph, kw - pw
            m = ((oh + dh >= 0) & (oh + dh < H) & (ow + dw >= 0) & (ow + dw < W))
            mask_list.append(m.reshape(1, HW))
    masks = jnp.stack(mask_list, axis=0).astype(dtype)          # (KH*KW, 1, HW)

    x_flat = x_nchw.reshape(N, Cin, HW)                          # free reshape (no HBM pass)

    kernel = functools.partial(
        _conv2dzeros_kernel,
        H=H, W=W, Cin=Cin, Cout=Cout, KH=KH, KW=KW, ph=ph, pw=pw,
    )

    out_flat = pl.pallas_call(
        kernel,
        out_shape=jax.ShapeDtypeStruct((N, Cout, HW), dtype),
        grid_spec=pltpu.PrefetchScalarGridSpec(
            num_scalar_prefetch=0,
            grid=(N,),
            in_specs=[
                pl.BlockSpec((1, Cin, HW), lambda n: (n, 0, 0)),            # activation
                pl.BlockSpec((KH * KW, Cout, Cin), lambda n: (0, 0, 0)),    # weights (resident)
                pl.BlockSpec((Cout, 1), lambda n: (0, 0)),                  # bias (resident)
                pl.BlockSpec((KH * KW, 1, HW), lambda n: (0, 0, 0)),        # masks (resident)
            ],
            out_specs=pl.BlockSpec((1, Cout, HW), lambda n: (n, 0, 0)),     # lane-dense output
            scratch_shapes=[
                pltpu.VMEM((Cin, HWp), dtype),        # zero-padded flat input
                pltpu.VMEM((Cout, HW), jnp.float32),  # f32 accumulator
            ],
        ),
        compiler_params=pltpu.CompilerParams(
            dimension_semantics=("parallel",),
        ),
    )(x_flat, w2, b2, masks)

    return out_flat.reshape(N, Cout, H, W)                       # free reshape


def _reference(x_nchw, weight_oihw, bias, logs, logscale_factor=3):
    """Pure-JAX reference mirroring the PyTorch module (NCHW / OIHW)."""
    out = lax.conv_general_dilated(
        x_nchw, weight_oihw,
        window_strides=(1, 1), padding="SAME",
        dimension_numbers=("NCHW", "OIHW", "NCHW"),
    )
    out = out + bias.reshape(1, -1, 1, 1)
    return out * jnp.exp(logs.reshape(1, -1, 1, 1) * logscale_factor)


if __name__ == "__main__":
    # Small shapes consistent with the module: batch=2, in=4, out=8, spatial=16.
    N, Cin, Cout, H, W = 2, 4, 8, 16, 16
    KH, KW = 3, 3

    key = jax.random.PRNGKey(0)
    kx, kw_, kb, kl = jax.random.split(key, 4)

    x = jax.random.normal(kx, (N, Cin, H, W), dtype=jnp.float32)

    # The module zero-initializes conv weight/bias and logs; use small deterministic
    # non-zero values so the kernel path is actually exercised.
    weight = 0.05 * jax.random.normal(kw_, (Cout, Cin, KH, KW), dtype=jnp.float32)
    bias = 0.05 * jax.random.normal(kb, (Cout,), dtype=jnp.float32)
    logs = 0.1 * jax.random.normal(kl, (Cout, 1, 1), dtype=jnp.float32)

    out = conv2d_zeros_pallas(x, weight, bias, logs, logscale_factor=3)
    out = jax.block_until_ready(out)

    ref = _reference(x, weight, bias, logs, logscale_factor=3)
    assert out.shape == (N, Cout, H, W)
    assert jnp.allclose(out, ref, atol=1e-4, rtol=1e-4), "mismatch vs reference"

    print("KERNEL_OK")
</pallas_src>

<mosaic_0001>
module attributes {stable_mosaic.version = 11 : i64} {
  func.func @_conv2dzeros_kernel(%arg0: i32, %arg1: memref<1x4x256xf32, #tpu.memory_space<vmem>>, %arg2: memref<9x8x4xf32, #tpu.memory_space<vmem>>, %arg3: memref<8x1xf32, #tpu.memory_space<vmem>>, %arg4: memref<9x1x256xf32, #tpu.memory_space<vmem>>, %arg5: memref<1x8x256xf32, #tpu.memory_space<vmem>>, %arg6: memref<4x290xf32, #tpu.memory_space<vmem>>, %arg7: memref<8x256xf32, #tpu.memory_space<vmem>>) attributes {dimension_semantics = [#tpu.dimension_semantics<parallel>], iteration_bounds = array<i64: 2>, scalar_prefetch = 0 : i64, scratch_operands = 2 : i64, tpu.core_type = #tpu.core_type<tc>, window_params = [{transform_indices = @transform_0, window_bounds = array<i64: 1, 4, 256>}, {pipeline_mode = #tpu.pipeline_mode<synchronous>, transform_indices = @transform_1, window_bounds = array<i64: 9, 8, 4>}, {pipeline_mode = #tpu.pipeline_mode<synchronous>, transform_indices = @transform_2, window_bounds = array<i64: 8, 1>}, {pipeline_mode = #tpu.pipeline_mode<synchronous>, transform_indices = @transform_3, window_bounds = array<i64: 9, 1, 256>}, {transform_indices = @transform_4, window_bounds = array<i64: 1, 8, 256>}]} {
    %cst = arith.constant 0.000000e+00 : f32
    %0 = vector.broadcast %cst : f32 to vector<4x17xf32>
    %c0 = arith.constant 0 : index
    %c0_0 = arith.constant 0 : index
    %1 = vector.load %arg6[%c0, %c0_0] : memref<4x290xf32, #tpu.memory_space<vmem>>, vector<4x17xf32>
    tpu.vector_store %arg6[%c0, %c0_0], %0 {strides = array<i32>} : memref<4x290xf32, #tpu.memory_space<vmem>>, vector<4x17xf32>,
    %cst_1 = arith.constant 0.000000e+00 : f32
    %2 = vector.broadcast %cst_1 : f32 to vector<4x17xf32>
    %c0_2 = arith.constant 0 : index
    %c273 = arith.constant 273 : index
    %3 = vector.load %arg6[%c0_2, %c273] : memref<4x290xf32, #tpu.memory_space<vmem>>, vector<4x17xf32>
    tpu.vector_store %arg6[%c0_2, %c273], %2 {strides = array<i32>} : memref<4x290xf32, #tpu.memory_space<vmem>>, vector<4x17xf32>,
    %c0_3 = arith.constant 0 : index
    %c0_4 = arith.constant 0 : index
    %c0_5 = arith.constant 0 : index
    %4 = vector.load %arg1[%c0_3, %c0_4, %c0_5] : memref<1x4x256xf32, #tpu.memory_space<vmem>>, vector<1x4x256xf32>
    %5 = vector.shape_cast %4 : vector<1x4x256xf32> to vector<4x256xf32>
    %c0_6 = arith.constant 0 : index
    %c17 = arith.constant 17 : index
    %6 = vector.load %arg6[%c0_6, %c17] : memref<4x290xf32, #tpu.memory_space<vmem>>, vector<4x256xf32>
    tpu.vector_store %arg6[%c0_6, %c17], %5 {strides = array<i32>} : memref<4x290xf32, #tpu.memory_space<vmem>>, vector<4x256xf32>,
    %cst_7 = arith.constant 0.000000e+00 : f32
    %7 = vector.broadcast %cst_7 : f32 to vector<8x256xf32>
    %c0_8 = arith.constant 0 : index
    %c0_9 = arith.constant 0 : index
    %8 = vector.load %arg7[%c0_8, %c0_9] : memref<8x256xf32, #tpu.memory_space<vmem>>, vector<8x256xf32>
    tpu.vector_store %arg7[%c0_8, %c0_9], %7 {strides = array<i32>} : memref<8x256xf32, #tpu.memory_space<vmem>>, vector<8x256xf32>,
    %c0_10 = arith.constant 0 : index
    %c0_11 = arith.constant 0 : index
    %9 = vector.load %arg6[%c0_10, %c0_11] : memref<4x290xf32, #tpu.memory_space<vmem>>, vector<4x256xf32>
    %c0_12 = arith.constant 0 : index
    %c0_13 = arith.constant 0 : index
    %c0_14 = arith.constant 0 : index
    %10 = vector.load %arg4[%c0_12, %c0_13, %c0_14] : memref<9x1x256xf32, #tpu.memory_space<vmem>>, vector<1x1x256xf32>
    %11 = vector.shape_cast %10 : vector<1x1x256xf32> to vector<1x256xf32>
    %12 = vector.broadcast %11 : vector<1x256xf32> to vector<4x256xf32>
    %13 = arith.mulf %9, %12 : vector<4x256xf32>
    %c0_15 = arith.constant 0 : index
    %c0_16 = arith.constant 0 : index
    %14 = vector.load %arg7[%c0_15, %c0_16] : memref<8x256xf32, #tpu.memory_space<vmem>>, vector<8x256xf32>
    %c0_17 = arith.constant 0 : index
    %c0_18 = arith.constant 0 : index
    %c0_19 = arith.constant 0 : index
    %15 = vector.load %arg2[%c0_17, %c0_18, %c0_19] : memref<9x8x4xf32, #tpu.memory_space<vmem>>, vector<1x8x4xf32>
    %16 = vector.shape_cast %15 : vector<1x8x4xf32> to vector<8x4xf32>
    %cst_20 = arith.constant dense<0.000000e+00> : vector<8x256xf32>
    %17 = tpu.matmul %16, %13, %cst_20 {dimension_numbers = #tpu.dot_dimension_numbers<[1], [0], [0], [1], [0, 0, 1, 1], [], []>} : vector<8x4xf32>, vector<4x256xf32>, vector<8x256xf32> -> vector<8x256xf32>
    %18 = arith.addf %14, %17 : vector<8x256xf32>
    %c0_21 = arith.constant 0 : index
    %c0_22 = arith.constant 0 : index
    %19 = vector.load %arg7[%c0_21, %c0_22] : memref<8x256xf32, #tpu.memory_space<vmem>>, vector<8x256xf32>
    tpu.vector_store %arg7[%c0_21, %c0_22], %18 {strides = array<i32>} : memref<8x256xf32, #tpu.memory_space<vmem>>, vector<8x256xf32>,
    %c0_23 = arith.constant 0 : index
    %c1 = arith.constant 1 : index
    %20 = vector.load %arg6[%c0_23, %c1] : memref<4x290xf32, #tpu.memory_space<vmem>>, vector<4x256xf32>
    %c1_24 = arith.constant 1 : index
    %c0_25 = arith.constant 0 : index
    %c0_26 = arith.constant 0 : index
    %21 = vector.load %arg4[%c1_24, %c0_25, %c0_26] : memref<9x1x256xf32, #tpu.memory_space<vmem>>, vector<1x1x256xf32>
    %22 = vector.shape_cast %21 : vector<1x1x256xf32> to vector<1x256xf32>
    %23 = vector.broadcast %22 : vector<1x256xf32> to vector<4x256xf32>
    %24 = arith.mulf %20, %23 : vector<4x256xf32>
    %c0_27 = arith.constant 0 : index
    %c0_28 = arith.constant 0 : index
    %25 = vector.load %arg7[%c0_27, %c0_28] : memref<8x256xf32, #tpu.memory_space<vmem>>, vector<8x256xf32>
    %c1_29 = arith.constant 1 : index
    %c0_30 = arith.constant 0 : index
    %c0_31 = arith.constant 0 : index
    %26 = vector.load %arg2[%c1_29, %c0_30, %c0_31] : memref<9x8x4xf32, #tpu.memory_space<vmem>>, vector<1x8x4xf32>
    %27 = vector.shape_cast %26 : vector<1x8x4xf32> to vector<8x4xf32>
    %cst_32 = arith.constant dense<0.000000e+00> : vector<8x256xf32>
    %28 = tpu.matmul %27, %24, %cst_32 {dimension_numbers = #tpu.dot_dimension_numbers<[1], [0], [0], [1], [0, 0, 1, 1], [], []>} : vector<8x4xf32>, vector<4x256xf32>, vector<8x256xf32> -> vector<8x256xf32>
    %29 = arith.addf %25, %28 : vector<8x256xf32>
    %c0_33 = arith.constant 0 : index
    %c0_34 = arith.constant 0 : index
    %30 = vector.load %arg7[%c0_33, %c0_34] : memref<8x256xf32, #tpu.memory_space<vmem>>, vector<8x256xf32>
    tpu.vector_store %arg7[%c0_33, %c0_34], %29 {strides = array<i32>} : memref<8x256xf32, #tpu.memory_space<vmem>>, vector<8x256xf32>,
    %c0_35 = arith.constant 0 : index
    %c2 = arith.constant 2 : index
    %31 = vector.load %arg6[%c0_35, %c2] : memref<4x290xf32, #tpu.memory_space<vmem>>, vector<4x256xf32>
    %c2_36 = arith.constant 2 : index
    %c0_37 = arith.constant 0 : index
    %c0_38 = arith.constant 0 : index
    %32 = vector.load %arg4[%c2_36, %c0_37, %c0_38] : memref<9x1x256xf32, #tpu.memory_space<vmem>>, vector<1x1x256xf32>
    %33 = vector.shape_cast %32 : vector<1x1x256xf32> to vector<1x256xf32>
    %34 = vector.broadcast %33 : vector<1x256xf32> to vector<4x256xf32>
    %35 = arith.mulf %31, %34 : vector<4x256xf32>
    %c0_39 = arith.constant 0 : index
    %c0_40 = arith.constant 0 : index
    %36 = vector.load %arg7[%c0_39, %c0_40] : memref<8x256xf32, #tpu.memory_space<vmem>>, vector<8x256xf32>
    %c2_41 = arith.constant 2 : index
    %c0_42 = arith.constant 0 : index
    %c0_43 = arith.constant 0 : index
    %37 = vector.load %arg2[%c2_41, %c0_42, %c0_43] : memref<9x8x4xf32, #tpu.memory_space<vmem>>, vector<1x8x4xf32>
    %38 = vector.shape_cast %37 : vector<1x8x4xf32> to vector<8x4xf32>
    %cst_44 = arith.constant dense<0.000000e+00> : vector<8x256xf32>
    %39 = tpu.matmul %38, %35, %cst_44 {dimension_numbers = #tpu.dot_dimension_numbers<[1], [0], [0], [1], [0, 0, 1, 1], [], []>} : vector<8x4xf32>, vector<4x256xf32>, vector<8x256xf32> -> vector<8x256xf32>
    %40 = arith.addf %36, %39 : vector<8x256xf32>
    %c0_45 = arith.constant 0 : index
    %c0_46 = arith.constant 0 : index
    %41 = vector.load %arg7[%c0_45, %c0_46] : memref<8x256xf32, #tpu.memory_space<vmem>>, vector<8x256xf32>
    tpu.vector_store %arg7[%c0_45, %c0_46], %40 {strides = array<i32>} : memref<8x256xf32, #tpu.memory_space<vmem>>, vector<8x256xf32>,
    %c0_47 = arith.constant 0 : index
    %c16 = arith.constant 16 : index
    %42 = vector.load %arg6[%c0_47, %c16] : memref<4x290xf32, #tpu.memory_space<vmem>>, vector<4x256xf32>
    %c3 = arith.constant 3 : index
    %c0_48 = arith.constant 0 : index
    %c0_49 = arith.constant 0 : index
    %43 = vector.load %arg4[%c3, %c0_48, %c0_49] : memref<9x1x256xf32, #tpu.memory_space<vmem>>, vector<1x1x256xf32>
    %44 = vector.shape_cast %43 : vector<1x1x256xf32> to vector<1x256xf32>
    %45 = vector.broadcast %44 : vector<1x256xf32> to vector<4x256xf32>
    %46 = arith.mulf %42, %45 : vector<4x256xf32>
    %c0_50 = arith.constant 0 : index
    %c0_51 = arith.constant 0 : index
    %47 = vector.load %arg7[%c0_50, %c0_51] : memref<8x256xf32, #tpu.memory_space<vmem>>, vector<8x256xf32>
    %c3_52 = arith.constant 3 : index
    %c0_53 = arith.constant 0 : index
    %c0_54 = arith.constant 0 : index
    %48 = vector.load %arg2[%c3_52, %c0_53, %c0_54] : memref<9x8x4xf32, #tpu.memory_space<vmem>>, vector<1x8x4xf32>
    %49 = vector.shape_cast %48 : vector<1x8x4xf32> to vector<8x4xf32>
    %cst_55 = arith.constant dense<0.000000e+00> : vector<8x256xf32>
    %50 = tpu.matmul %49, %46, %cst_55 {dimension_numbers = #tpu.dot_dimension_numbers<[1], [0], [0], [1], [0, 0, 1, 1], [], []>} : vector<8x4xf32>, vector<4x256xf32>, vector<8x256xf32> -> vector<8x256xf32>
    %51 = arith.addf %47, %50 : vector<8x256xf32>
    %c0_56 = arith.constant 0 : index
    %c0_57 = arith.constant 0 : index
    %52 = vector.load %arg7[%c0_56, %c0_57] : memref<8x256xf32, #tpu.memory_space<vmem>>, vector<8x256xf32>
    tpu.vector_store %arg7[%c0_56, %c0_57], %51 {strides = array<i32>} : memref<8x256xf32, #tpu.memory_space<vmem>>, vector<8x256xf32>,
    %c0_58 = arith.constant 0 : index
    %c17_59 = arith.constant 17 : index
    %53 = vector.load %arg6[%c0_58, %c17_59] : memref<4x290xf32, #tpu.memory_space<vmem>>, vector<4x256xf32>
    %c4 = arith.constant 4 : index
    %c0_60 = arith.constant 0 : index
    %c0_61 = arith.constant 0 : index
    %54 = vector.load %arg4[%c4, %c0_60, %c0_61] : memref<9x1x256xf32, #tpu.memory_space<vmem>>, vector<1x1x256xf32>
    %55 = vector.shape_cast %54 : vector<1x1x256xf32> to vector<1x256xf32>
    %56 = vector.broadcast %55 : vector<1x256xf32> to vector<4x256xf32>
    %57 = arith.mulf %53, %56 : vector<4x256xf32>
    %c0_62 = arith.constant 0 : index
    %c0_63 = arith.constant 0 : index
    %58 = vector.load %arg7[%c0_62, %c0_63] : memref<8x256xf32, #tpu.memory_space<vmem>>, vector<8x256xf32>
    %c4_64 = arith.constant 4 : index
    %c0_65 = arith.constant 0 : index
    %c0_66 = arith.constant 0 : index
    %59 = vector.load %arg2[%c4_64, %c0_65, %c0_66] : memref<9x8x4xf32, #tpu.memory_space<vmem>>, vector<1x8x4xf32>
    %60 = vector.shape_cast %59 : vector<1x8x4xf32> to vector<8x4xf32>
    %cst_67 = arith.constant dense<0.000000e+00> : vector<8x256xf32>
    %61 = tpu.matmul %60, %57, %cst_67 {dimension_numbers = #tpu.dot_dimension_numbers<[1], [0], [0], [1], [0, 0, 1, 1], [], []>} : vector<8x4xf32>, vector<4x256xf32>, vector<8x256xf32> -> vector<8x256xf32>
    %62 = arith.addf %58, %61 : vector<8x256xf32>
    %c0_68 = arith.constant 0 : index
    %c0_69 = arith.constant 0 : index
    %63 = vector.load %arg7[%c0_68, %c0_69] : memref<8x256xf32, #tpu.memory_space<vmem>>, vector<8x256xf32>
    tpu.vector_store %arg7[%c0_68, %c0_69], %62 {strides = array<i32>} : memref<8x256xf32, #tpu.memory_space<vmem>>, vector<8x256xf32>,
    %c0_70 = arith.constant 0 : index
    %c18 = arith.constant 18 : index
    %64 = vector.load %arg6[%c0_70, %c18] : memref<4x290xf32, #tpu.memory_space<vmem>>, vector<4x256xf32>
    %c5 = arith.constant 5 : index
    %c0_71 = arith.constant 0 : index
    %c0_72 = arith.constant 0 : index
    %65 = vector.load %arg4[%c5, %c0_71, %c0_72] : memref<9x1x256xf32, #tpu.memory_space<vmem>>, vector<1x1x256xf32>
    %66 = vector.shape_cast %65 : vector<1x1x256xf32> to vector<1x256xf32>
    %67 = vector.broadcast %66 : vector<1x256xf32> to vector<4x256xf32>
    %68 = arith.mulf %64, %67 : vector<4x256xf32>
    %c0_73 = arith.constant 0 : index
    %c0_74 = arith.constant 0 : index
    %69 = vector.load %arg7[%c0_73, %c0_74] : memref<8x256xf32, #tpu.memory_space<vmem>>, vector<8x256xf32>
    %c5_75 = arith.constant 5 : index
    %c0_76 = arith.constant 0 : index
    %c0_77 = arith.constant 0 : index
    %70 = vector.load %arg2[%c5_75, %c0_76, %c0_77] : memref<9x8x4xf32, #tpu.memory_space<vmem>>, vector<1x8x4xf32>
    %71 = vector.shape_cast %70 : vector<1x8x4xf32> to vector<8x4xf32>
    %cst_78 = arith.constant dense<0.000000e+00> : vector<8x256xf32>
    %72 = tpu.matmul %71, %68, %cst_78 {dimension_numbers = #tpu.dot_dimension_numbers<[1], [0], [0], [1], [0, 0, 1, 1], [], []>} : vector<8x4xf32>, vector<4x256xf32>, vector<8x256xf32> -> vector<8x256xf32>
    %73 = arith.addf %69, %72 : vector<8x256xf32>
    %c0_79 = arith.constant 0 : index
    %c0_80 = arith.constant 0 : index
    %74 = vector.load %arg7[%c0_79, %c0_80] : memref<8x256xf32, #tpu.memory_space<vmem>>, vector<8x256xf32>
    tpu.vector_store %arg7[%c0_79, %c0_80], %73 {strides = array<i32>} : memref<8x256xf32, #tpu.memory_space<vmem>>, vector<8x256xf32>,
    %c0_81 = arith.constant 0 : index
    %c32 = arith.constant 32 : index
    %75 = vector.load %arg6[%c0_81, %c32] : memref<4x290xf32, #tpu.memory_space<vmem>>, vector<4x256xf32>
    %c6 = arith.constant 6 : index
    %c0_82 = arith.constant 0 : index
    %c0_83 = arith.constant 0 : index
    %76 = vector.load %arg4[%c6, %c0_82, %c0_83] : memref<9x1x256xf32, #tpu.memory_space<vmem>>, vector<1x1x256xf32>
    %77 = vector.shape_cast %76 : vector<1x1x256xf32> to vector<1x256xf32>
    %78 = vector.broadcast %77 : vector<1x256xf32> to vector<4x256xf32>
    %79 = arith.mulf %75, %78 : vector<4x256xf32>
    %c0_84 = arith.constant 0 : index
    %c0_85 = arith.constant 0 : index
    %80 = vector.load %arg7[%c0_84, %c0_85] : memref<8x256xf32, #tpu.memory_space<vmem>>, vector<8x256xf32>
    %c6_86 = arith.constant 6 : index
    %c0_87 = arith.constant 0 : index
    %c0_88 = arith.constant 0 : index
    %81 = vector.load %arg2[%c6_86, %c0_87, %c0_88] : memref<9x8x4xf32, #tpu.memory_space<vmem>>, vector<1x8x4xf32>
    %82 = vector.shape_cast %81 : vector<1x8x4xf32> to vector<8x4xf32>
    %cst_89 = arith.constant dense<0.000000e+00> : vector<8x256xf32>
    %83 = tpu.matmul %82, %79, %cst_89 {dimension_numbers = #tpu.dot_dimension_numbers<[1], [0], [0], [1], [0, 0, 1, 1], [], []>} : vector<8x4xf32>, vector<4x256xf32>, vector<8x256xf32> -> vector<8x256xf32>
    %84 = arith.addf %80, %83 : vector<8x256xf32>
    %c0_90 = arith.constant 0 : index
    %c0_91 = arith.constant 0 : index
    %85 = vector.load %arg7[%c0_90, %c0_91] : memref<8x256xf32, #tpu.memory_space<vmem>>, vector<8x256xf32>
    tpu.vector_store %arg7[%c0_90, %c0_91], %84 {strides = array<i32>} : memref<8x256xf32, #tpu.memory_space<vmem>>, vector<8x256xf32>,
    %c0_92 = arith.constant 0 : index
    %c33 = arith.constant 33 : index
    %86 = vector.load %arg6[%c0_92, %c33] : memref<4x290xf32, #tpu.memory_space<vmem>>, vector<4x256xf32>
    %c7 = arith.constant 7 : index
    %c0_93 = arith.constant 0 : index
    %c0_94 = arith.constant 0 : index
    %87 = vector.load %arg4[%c7, %c0_93, %c0_94] : memref<9x1x256xf32, #tpu.memory_space<vmem>>, vector<1x1x256xf32>
    %88 = vector.shape_cast %87 : vector<1x1x256xf32> to vector<1x256xf32>
    %89 = vector.broadcast %88 : vector<1x256xf32> to vector<4x256xf32>
    %90 = arith.mulf %86, %89 : vector<4x256xf32>
    %c0_95 = arith.constant 0 : index
    %c0_96 = arith.constant 0 : index
    %91 = vector.load %arg7[%c0_95, %c0_96] : memref<8x256xf32, #tpu.memory_space<vmem>>, vector<8x256xf32>
    %c7_97 = arith.constant 7 : index
    %c0_98 = arith.constant 0 : index
    %c0_99 = arith.constant 0 : index
    %92 = vector.load %arg2[%c7_97, %c0_98, %c0_99] : memref<9x8x4xf32, #tpu.memory_space<vmem>>, vector<1x8x4xf32>
    %93 = vector.shape_cast %92 : vector<1x8x4xf32> to vector<8x4xf32>
    %cst_100 = arith.constant dense<0.000000e+00> : vector<8x256xf32>
    %94 = tpu.matmul %93, %90, %cst_100 {dimension_numbers = #tpu.dot_dimension_numbers<[1], [0], [0], [1], [0, 0, 1, 1], [], []>} : vector<8x4xf32>, vector<4x256xf32>, vector<8x256xf32> -> vector<8x256xf32>
    %95 = arith.addf %91, %94 : vector<8x256xf32>
    %c0_101 = arith.constant 0 : index
    %c0_102 = arith.constant 0 : index
    %96 = vector.load %arg7[%c0_101, %c0_102] : memref<8x256xf32, #tpu.memory_space<vmem>>, vector<8x256xf32>
    tpu.vector_store %arg7[%c0_101, %c0_102], %95 {strides = array<i32>} : memref<8x256xf32, #tpu.memory_space<vmem>>, vector<8x256xf32>,
    %c0_103 = arith.constant 0 : index
    %c34 = arith.constant 34 : index
    %97 = vector.load %arg6[%c0_103, %c34] : memref<4x290xf32, #tpu.memory_space<vmem>>, vector<4x256xf32>
    %c8 = arith.constant 8 : index
    %c0_104 = arith.constant 0 : index
    %c0_105 = arith.constant 0 : index
    %98 = vector.load %arg4[%c8, %c0_104, %c0_105] : memref<9x1x256xf32, #tpu.memory_space<vmem>>, vector<1x1x256xf32>
    %99 = vector.shape_cast %98 : vector<1x1x256xf32> to vector<1x256xf32>
    %100 = vector.broadcast %99 : vector<1x256xf32> to vector<4x256xf32>
    %101 = arith.mulf %97, %100 : vector<4x256xf32>
    %c0_106 = arith.constant 0 : index
    %c0_107 = arith.constant 0 : index
    %102 = vector.load %arg7[%c0_106, %c0_107] : memref<8x256xf32, #tpu.memory_space<vmem>>, vector<8x256xf32>
    %c8_108 = arith.constant 8 : index
    %c0_109 = arith.constant 0 : index
    %c0_110 = arith.constant 0 : index
    %103 = vector.load %arg2[%c8_108, %c0_109, %c0_110] : memref<9x8x4xf32, #tpu.memory_space<vmem>>, vector<1x8x4xf32>
    %104 = vector.shape_cast %103 : vector<1x8x4xf32> to vector<8x4xf32>
    %cst_111 = arith.constant dense<0.000000e+00> : vector<8x256xf32>
    %105 = tpu.matmul %104, %101, %cst_111 {dimension_numbers = #tpu.dot_dimension_numbers<[1], [0], [0], [1], [0, 0, 1, 1], [], []>} : vector<8x4xf32>, vector<4x256xf32>, vector<8x256xf32> -> vector<8x256xf32>
    %106 = arith.addf %102, %105 : vector<8x256xf32>
    %c0_112 = arith.constant 0 : index
    %c0_113 = arith.constant 0 : index
    %107 = vector.load %arg7[%c0_112, %c0_113] : memref<8x256xf32, #tpu.memory_space<vmem>>, vector<8x256xf32>
    tpu.vector_store %arg7[%c0_112, %c0_113], %106 {strides = array<i32>} : memref<8x256xf32, #tpu.memory_space<vmem>>, vector<8x256xf32>,
    %c0_114 = arith.constant 0 : index
    %c0_115 = arith.constant 0 : index
    %108 = vector.load %arg7[%c0_114, %c0_115] : memref<8x256xf32, #tpu.memory_space<vmem>>, vector<8x256xf32>
    %c0_116 = arith.constant 0 : index
    %c0_117 = arith.constant 0 : index
    %109 = vector.load %arg3[%c0_116, %c0_117] : memref<8x1xf32, #tpu.memory_space<vmem>>, vector<8x1xf32>
    %110 = vector.broadcast %109 : vector<8x1xf32> to vector<8x256xf32>
    %111 = arith.addf %108, %110 : vector<8x256xf32>
    %c0_118 = arith.constant 0 : index
    %c0_119 = arith.constant 0 : index
    %c0_120 = arith.constant 0 : index
    %112 = vector.load %arg5[%c0_118, %c0_119, %c0_120] : memref<1x8x256xf32, #tpu.memory_space<vmem>>, vector<1x8x256xf32>
    %113 = vector.shape_cast %112 : vector<1x8x256xf32> to vector<8x256xf32>
    %114 = vector.shape_cast %111 : vector<8x256xf32> to vector<1x8x256xf32>
    tpu.vector_store %arg5[%c0_118, %c0_119, %c0_120], %114 {strides = array<i32>} : memref<1x8x256xf32, #tpu.memory_space<vmem>>, vector<1x8x256xf32>,
    return
  }
  func.func @transform_0(%arg0: i32) -> (i32, i32, i32) {
    %c0_i32 = arith.constant 0 : i32
    %c0_i32_0 = arith.constant 0 : i32
    %c0_i32_1 = arith.constant 0 : i32
    return %arg0, %c0_i32, %c0_i32_0 : i32, i32, i32
  }
  func.func @transform_1(%arg0: i32) -> (i32, i32, i32) {
    %c0_i32 = arith.constant 0 : i32
    %c0_i32_0 = arith.constant 0 : i32
    %c0_i32_1 = arith.constant 0 : i32
    %c0_i32_2 = arith.constant 0 : i32
    return %c0_i32, %c0_i32_0, %c0_i32_1 : i32, i32, i32
  }
  func.func @transform_2(%arg0: i32) -> (i32, i32) {
    %c0_i32 = arith.constant 0 : i32
    %c0_i32_0 = arith.constant 0 : i32
    %c0_i32_1 = arith.constant 0 : i32
    return %c0_i32, %c0_i32_0 : i32, i32
  }
  func.func @transform_3(%arg0: i32) -> (i32, i32, i32) {
    %c0_i32 = arith.constant 0 : i32
    %c0_i32_0 = arith.constant 0 : i32
    %c0_i32_1 = arith.constant 0 : i32
    %c0_i32_2 = arith.constant 0 : i32
    return %c0_i32, %c0_i32_0, %c0_i32_1 : i32, i32, i32
  }
  func.func @transform_4(%arg0: i32) -> (i32, i32, i32) {
    %c0_i32 = arith.constant 0 : i32
    %c0_i32_0 = arith.constant 0 : i32
    %c0_i32_1 = arith.constant 0 : i32
    return %arg0, %c0_i32, %c0_i32_0 : i32, i32, i32
  }
}

</mosaic_0001>

<bundles_post_ra>
// kernel: tpu_custom_call.1
= control target key start
LH: loop header
LB: loop body
LE: loop exit
PB: predicated region body
PF: predicated region fallthrough
CT: control target
= control target key end

     0   :  { %9 = vsyncpa [#allocation5], 0  ;;  %s1833_s0 = inlined_call_operand.vmem [shape: f32[2,4,256], index: 0, kind: input, shape index: {}]   ;;  %s1834_s1 = inlined_call_operand.vmem [shape: f32[9,8,4], index: 1, kind: input, shape index: {}]   ;;  %s1835_s2 = inlined_call_operand.vmem [shape: f32[8,1], index: 2, kind: input, shape index: {}]   ;;  %s1836_s3 = inlined_call_operand.vmem [shape: f32[9,1,256], index: 3, kind: input, shape index: {}]   ;;  %s1837_s4 = inlined_call_operand.hbm [shape: f32[2,8,256], index: 4, kind: output, shape index: {}]  }
   0x1   :  { %11 = vsyncpa [#allocation5 + $0x1], 0  ;;  %s1612_s15 = smov 0   ;;  %s1614_s16 = smov 0  }
   0x2   :  { %s1616_s17 = smov 0   ;;  %s1618_s18 = smov 0  }
   0x3 LB: > { %s1633_s19 = sadd.s32 4294967295, %s1566_s18   ;;  %s1372_s20 = sadd.s32 4294967294, %s1566_s18   ;;  %s1566_s18 = sphi %s1618_s18, %s1843_s18   ;;  %s1562_s17 = sphi %s1616_s17, %s1842_s17   ;;  %s1558_s16 = sphi %s1614_s16, %s1841_s16   ;;  %s1554_s15 = sphi %s1612_s15, %s1840_s15  }
   0x4   : > { %s1637_s21 = sadd.s32 1, %s1566_s18   ;;  %s113_s22 = sadd.s32 1, %s1562_s17 }
   0x5   : > { %s110_s23 = ssub.s32 %s1566_s18, %s1637_s21  ;;  %p123_p0 = scmp.ne.s32.totalorder %s1562_s17, %s1558_s16 }
   0x6   : > { %p111_p1 = scmp.eq.s32.totalorder %s110_s23, 0  ;;  %p124_p2 = scmp.eq.s32.totalorder %s1633_s19, 1 }
   0x7   : > { %p129_p3 = scmp.ne.s32.totalorder %s1558_s16, %s1554_s15  ;;  %p130_p4 = scmp.eq.s32.totalorder %s1372_s20, 1 }
   0x8   : > { %s1648_s24 = scalar_select %p111_p1, %s1562_s17, %s113_s22  }
   0x9   : > { %p1650_p5 = por %p124_p2, %p123_p0  ;;  %p1654_p6 = por %p130_p4, %p129_p3 }
   0xa   : > { %p1375_p7 = scmp.ge.s32.totalorder %s1566_s18, 1  ;;  %p165_p8 = scmp.lt.s32.totalorder %s1566_s18, 3 }
   0xc   : > { %p166_p9 = pnand %p1375_p7, %p165_p8 }
   0xd   : > { %p191_p10 = scmp.lt.s32.totalorder (!%p166_p9), %s1633_s19, 1  ;;  %v219_v0 = vlaneseq (!%p166_p9)  ;;  %v1402_v2 = vld [vmem:[%s1836_s3 + $0xa] sm:$0x3] (!%p166_p9)  ;;  %v1397_v3 = vld [vmem:[%s1836_s3 + $0x8] sm:$0x3] (!%p166_p9)  ;;  %vm196_vm0 = vcmask (!%p166_p9), 134144  }
   0xe   : > { %169 = sbr.rel (%p166_p9) target bundleno = 546 (0x222), region = 36  ;;  %v1382_v4 = vld [vmem:[%s1836_s3 + $0x2] sm:$0x3] (!%p166_p9)  ;;  %v1407_v5 = vld [vmem:[%s1836_s3 + $0xc] sm:$0x3] (!%p166_p9)  ;;  %v1568_v8 = vmov (!%p166_p9), 0.0  }
   0xf   : > { %v220_v1 = vshrl.u32 (!%p166_p9), %v219_v0, 7  ;;  %197 = vst.msk [vmem:[#allocation2] sm:$0xf] (!%p166_p9), %vm196_vm0, %v1568_v8  ;;  %vm198_vm1 = vcmask (!%p166_p9), 273544   ;;  %791 = vmatprep.mubr.f32.mxu0 (!%p166_p9), %v1568_v8  ;;  %308 = vmatprep.mubr.f32.mxu1 (!%p166_p9), %v1568_v8  ;;  %s1569_s14 = smov (!%p166_p9), 17   ;;  %s1570_s28 = smov (!%p166_p9), 18  }
  0x10   : > { %199 = vst.msk [vmem:[#allocation2 + $0x8] sm:$0xf] (!%p166_p9), %vm198_vm1, %v1568_v8  ;;  %v1387_v18 = vld [vmem:[%s1836_s3 + $0x4] sm:$0x3] (!%p166_p9)  ;;  %v1412_v21 = vld [vmem:[%s1836_s3 + $0xe] sm:$0x3] (!%p166_p9) }
  0x11   : > { %v221_v6 = vsub.s32 (!%p166_p9), 0, %v220_v1  ;;  %v225_v7 = vsub.s32 (!%p166_p9), 1, %v220_v1  ;;  %v217_v25 = vld [vmem:[%s1836_s3] sm:$0x3] (!%p166_p9)  ;;  %v1392_v29 = vld [vmem:[%s1836_s3 + $0x6] sm:$0x3] (!%p166_p9) }
  0x12   : > { %v1417_v30 = vld [vmem:[%s1836_s3 + $0x10] sm:$0x3] (!%p166_p9)  ;;  %s1571_s9 = smov (!%p166_p9), 1   ;;  %s1573_s11 = smov (!%p166_p9), 2   ;;  %vm209_vm2 = vcmask (!%p166_p9), 1043592   ;;  %vm210_vm3 = vcmask (!%p166_p9), 1047556  }
  0x13   : > { %v810_v10 = vrot.slane (!%p166_p9), %v1402_v2, %v221_v6  ;;  %v814_v11 = vrot.slane (!%p166_p9), %v1402_v2, %v225_v7  ;;  %v690_v12 = vrot.slane (!%p166_p9), %v1397_v3, %v221_v6  ;;  %v694_v13 = vrot.slane (!%p166_p9), %v1397_v3, %v225_v7  ;;  %s1574_s12 = smov (!%p166_p9), 33   ;;  %vm211_vm5 = vmor (!%p166_p9), %vm210_vm3, %vm209_vm2  ;;  %s1577_s20 = smov (!%p166_p9), 110  }
  0x14   : > { %v327_v14 = vrot.slane (!%p166_p9), %v1382_v4, %v221_v6  ;;  %v331_v15 = vrot.slane (!%p166_p9), %v1382_v4, %v225_v7  ;;  %v931_v16 = vrot.slane (!%p166_p9), %v1407_v5, %v221_v6  ;;  %v935_v17 = vrot.slane (!%p166_p9), %v1407_v5, %v225_v7  ;;  %s1578_s22 = smov (!%p166_p9), 111   ;;  %s1579_s23 = smov (!%p166_p9), 127  }
  0x15   : > { %s192_s27 = scalar_select %p191_p10, %s1633_s19, 1  ;;  %v815_v19 = vcombine.low %v810_v10, %v814_v11  ;;  %v695_v20 = vcombine.low %v690_v12, %v694_v13  ;;  %v448_v23 = vrot.slane %v1387_v18, %v221_v6  ;;  %v452_v24 = vrot.slane %v1387_v18, %v225_v7 }
  0x16   : > { %v332_v22 = vcombine.low %v327_v14, %v331_v15  ;;  %v936_v26 = vcombine.low %v931_v16, %v935_v17  ;;  %v1052_v27 = vrot.slane %v1412_v21, %v221_v6  ;;  %v1056_v28 = vrot.slane %v1412_v21, %v225_v7  ;;  %s1581_s30 = smov 126   ;;  %s1582_s5 = smov 95  }
  0x17   : > { %s1427_s10 = sshll.u32 %s192_s27, 3  ;;  %816 = vrot.lane.b32.xlu1 %v815_v19, %s1570_s28  ;;  %v222_v31 = vrot.slane %v217_v25, %v221_v6  ;;  %v226_v32 = vrot.slane %v217_v25, %v225_v7  ;;  %v453_v33 = vcombine.low %v448_v23, %v452_v24  ;;  %v569_v34 = vrot.slane %v1392_v29, %v221_v6  ;;  %s1580_s27 = smov 96  }
  0x18   : > { %s195_s13 = scalar_lea.vmem %s1833_s0, %s1427_s10  ;;  %v573_v35 = vrot.slane %v1392_v29, %v225_v7  ;;  %s1572_s10 = smov 32   ;;  %v1057_v36 = vcombine.low %v1052_v27, %v1056_v28  ;;  %v1173_v37 = vrot.slane %v1417_v30, %v221_v6  ;;  %v1177_v38 = vrot.slane %v1417_v30, %v225_v7  ;;  %v232_v6 = vld [vmem:[%s1834_s1] sm:$0xff] }
  0x19   : > { %v200_v9 = vld [vmem:[%s195_s13] sm:$0xff]  ;;  %v227_v39 = vcombine.low %v222_v31, %v226_v32  ;;  %s1575_s13 = smov 16   ;;  %vm205_vm4 = vcmask 138240   ;;  %vm239_vm6 = vcmask 1043456   ;;  %vm336_vm7 = vcmask 7168   ;;  %s1584_s6 = smov 112  }
  0x1a   : > { %202 = vrot.lane.b32.xlu0 %v200_v9, %s1569_s14  ;;  %v574_v40 = vcombine.low %v569_v34, %v573_v35  ;;  %v1178_v41 = vcombine.low %v1173_v37, %v1177_v38  ;;  %vm819_vm8 = vcmask 146432   ;;  %vm457_vm9 = vcmask 15360   ;;  %s1585_s7 = smov 94  }
  0x1b   : > { %333 = vrot.lane.b32.xlu1 %v332_v22, %s1571_s9  ;;  %vm235_vm10 = vcmask 31744   ;;  %vm940_vm11 = vcmask 261120   ;;  %vm1061_vm12 = vcmask 269312   ;;  %vm578_vm13 = vcmask 130048   ;;  %s188_s9 = sand.u32 1, %s1558_s16  }
  0x1c   : > { %vm1182_vm14 = vcmask 277504   ;;  %vm717_vm15 = vcmask 908288   ;;  %vm355_vm1 = vcmask 1039360   ;;  %vm959_vm2 = vcmask 785408  }
  0x1d   : > { %vm476_vm3 = vcmask 1031168  }
  0x1e   : > { %696 = vrot.lane.b32.xlu0 %v695_v20, %s1569_s14  ;;  %s1576_s14 = smov 34  }
  0x1f   : > { %454 = vrot.lane.b32.xlu1 %v453_v33, %s1573_s11  ;;  %s1428_s11 = sshll.u32 %s1633_s19, 8  ;;  %s1586_s19 = smov [#allocation4]  }
  0x20   : > { %s1508_s28 = sshll.u32 %s1586_s19, 4  ;;  %s1509_s28 = int_to_ptr.vmem [resolvable:$false] %s1508_s28 }
  0x21   : > { %s1510_s29 = scalar_lea.vmem %s1509_s28, 512 }
  0x22   : > { %937 = vrot.lane.b32.xlu0 %v936_v26, %s1572_s10  ;;  %s1376_s10 = sshll.u32 %s188_s9, 4 }
  0x23   : > { %575 = vrot.lane.b32.xlu1 %v574_v40, %s1575_s13 }
  0x26   : > { %1058 = vrot.lane.b32.xlu0 %v1057_v36, %s1574_s12  ;;  %s190_s12 = scalar_lea.vmem [#allocation4], %s1376_s10 }
  0x27   : > { %s1313_s13 = sshll.u32 %s190_s12, 4  ;;  %s1793_s13 = int_to_ptr.vmem [resolvable:$true] %s1313_s13 }
  0x28   : > { %p1511_p0 = scmp.lt.s32.totalorder %s1793_s13, %s1509_s28 }
  0x2a   : > { %1179 = vrot.lane.b32.xlu0 %v1178_v41, %s1576_s14 }
  0x89   : > { %v817_v45 = vpop.permute.xlu1 %816 }
  0x8a   : > { %v818_v48 = vrot.slane %v817_v45, 4 }
  0x8c   : > { %v203_v42 = vpop.permute.xlu0 %202  ;;  %v820_v7 = vsel %vm819_vm8, %v818_v48, %v817_v45 }
  0x8d   : > { %v204_v43 = vrot.slane %v203_v42, 4  ;;  %v334_v47 = vpop.permute.xlu1 %333 }
  0x8e   : > { %v335_v55 = vrot.slane %v334_v47, 4 }
  0x8f   : > { %v206_v44 = vsel %vm205_vm4, %v204_v43, %v203_v42  ;;  %213 = vst.msk [vmem:[#allocation2 + $0x8] sm:$0xf] %vm196_vm0, %v204_v43  ;;  %v1288_v43 = vld [vmem:[%s1835_s2] sm:$0xff]  ;;  %vm838_vm0 = vcmask 900096  }
  0x90   : > { %212 = vst.msk [vmem:[#allocation2] sm:$0xff] %vm211_vm5, %v206_v44  ;;  %v697_v46 = vpop.permute.xlu0 %696  ;;  %v337_v4 = vsel %vm336_vm7, %v335_v55, %v334_v47  ;;  %vm597_vm5 = vcmask 916480   ;;  %vm1201_vm7 = vcmask 769024  }
  0x91   : > { %v698_v49 = vrot.slane %v697_v46, 4  ;;  %v455_v1 = vpop.permute.xlu1 %454 }
  0x92   : > { %v456_v5 = vrot.slane %v455_v1, 4 }
  0x93   : > { %v699_v59 = vsel %vm205_vm4, %v698_v49, %v697_v46  ;;  %vm1080_vm4 = vcmask 777216  }
  0x94   : > { %v938_v57 = vpop.permute.xlu0 %937  ;;  %v458_v11 = vsel %vm457_vm9, %v456_v5, %v455_v1 }
  0x95   : > { %v939_v62 = vrot.slane %v938_v57, 4  ;;  %v576_v19 = vpop.permute.xlu1 %575 }
  0x96   : > { %v803_v50 = vld [vmem:[#allocation2 + $0x8] sm:$0xf]  ;;  %v577_v24 = vrot.slane %v576_v19, 4 }
  0x97   : > { %v683_v51 = vld [vmem:[#allocation2 + $0x8] sm:$0xf]  ;;  %v1699_v52 = vld [vmem:[#allocation2] sm:$0xff]  ;;  %v824_v53 = vmul.f32 %v818_v48, %v803_v50  ;;  %v941_v14 = vsel %vm940_vm11, %v939_v62, %v938_v57 }
  0x98   : > { %v703_v54 = vmul.f32 %v698_v49, %v683_v51  ;;  %v320_v56 = vld [vmem:[#allocation2 + $0x8] sm:$0xf]  ;;  %v229_v58 = vmul.f32 %v1699_v52, %v227_v39  ;;  %v702_v60 = vmul.f32 %v1699_v52, %v699_v59  ;;  %v823_v9 = vmul.f32 %v820_v7, %v1699_v52  ;;  %v1059_v15 = vpop.permute.xlu0 %1058 }
  0x99   : > { %836 = vrot.lane.b32.xlu1 %v824_v53, %s1577_s20  ;;  %v341_v61 = vmul.f32 %v335_v55, %v320_v56  ;;  %v924_v63 = vld [vmem:[#allocation2 + $0x8] sm:$0xf]  ;;  %v340_v10 = vmul.f32 %v1699_v52, %v337_v4  ;;  %v461_v12 = vmul.f32 %v1699_v52, %v458_v11  ;;  %v944_v16 = vmul.f32 %v941_v14, %v1699_v52  ;;  %v1388_v11 = vld [vmem:[%s1834_s1 + $0x10] sm:$0xff] }
  0x9a   : > { %715 = vrot.lane.b32.xlu0 %v703_v54, %s1578_s22  ;;  %v234_v0 = vcombine.high %v229_v58, %v229_v58  ;;  %v945_v2 = vmul.f32 %v939_v62, %v924_v63  ;;  %v710_v3 = vcombine.high %v702_v60, %v702_v60  ;;  %v831_v13 = vcombine.high %v823_v9, %v823_v9  ;;  %v441_v20 = vld [vmem:[#allocation2 + $0x8] sm:$0xf] }
  0x9b   : > { %v348_v17 = vcombine.high %v340_v10, %v340_v10  ;;  %v1060_v18 = vrot.slane %v1059_v15, 4  ;;  %v462_v21 = vmul.f32 %v456_v5, %v441_v20  ;;  %v952_v22 = vcombine.high %v944_v16, %v944_v16  ;;  %v1045_v26 = vld [vmem:[#allocation2 + $0x8] sm:$0xf]  ;;  %v1408_v5 = vld [vmem:[%s1834_s1 + $0x30] sm:$0xff] }
  0x9c   : > { %1379 = vmatprep.subr.msk.mxu1 %vm239_vm6, %v234_v0  ;;  %v1180_v25 = vpop.permute.xlu0 %1179  ;;  %v469_v29 = vcombine.high %v461_v12, %v461_v12  ;;  %v579_v30 = vsel %vm578_vm13, %v577_v24, %v576_v19  ;;  %v562_v35 = vld [vmem:[#allocation2 + $0x8] sm:$0xf]  ;;  %v1583_v39 = vmov 0  }
  0x9d   : > { %711 = vrot.lane.b32.xlu1 %v702_v60, %s1578_s22  ;;  %1380 = vmatpush1.msk.msra.mxu1 %vm239_vm6, %v229_v58  ;;  %v1062_v23 = vsel %vm1061_vm12, %v1060_v18, %v1059_v15  ;;  %v1066_v28 = vmul.f32 %v1060_v18, %v1045_v26  ;;  %v1181_v31 = vrot.slane %v1180_v25, 4  ;;  %v582_v32 = vmul.f32 %v1699_v52, %v579_v30  ;;  %v1166_v40 = vld [vmem:[#allocation2 + $0x8] sm:$0xf] }
  0x9e   : > { %353 = vrot.lane.b32.xlu0 %v341_v61, %s1579_s23  ;;  %1381 = vmatmul.mubr.msk.f32.vlgmr.msra.gmra.mrb[0].mxu1 %vm235_vm10, %v232_v6  ;;  %v1065_v27 = vmul.f32 %v1062_v23, %v1699_v52  ;;  %v583_v36 = vmul.f32 %v577_v24, %v562_v35  ;;  %v1403_v59 = vld [vmem:[%s1834_s1 + $0x28] sm:$0xff] }
  0x9f   : > { %429 = vmatprep.mubr.f32.mxu1 %v1568_v8  ;;  %v1183_v34 = vsel %vm1182_vm14, %v1181_v31, %v1180_v25  ;;  %v590_v38 = vcombine.high %v582_v32, %v582_v32  ;;  %1502 = vset.pattern.permute.xlu1 %v1583_v39  ;;  %v1187_v41 = vmul.f32 %v1181_v31, %v1166_v40  ;;  %v1383_v0 = vld [vmem:[%s1834_s1 + $0x8] sm:$0xff]  ;;  %v1393_v25 = vld [vmem:[%s1834_s1 + $0x18] sm:$0xff] }
  0xa0   : > { %v1073_v33 = vcombine.high %v1065_v27, %v1065_v27  ;;  %v1186_v37 = vmul.f32 %v1183_v34, %v1699_v52  ;;  %1503 = vset.pattern.permute.xlu0 %v1583_v39  ;;  %v1398_v52 = vld [vmem:[%s1834_s1 + $0x20] sm:$0xff] }
  0xa1   : > { %713 = vrot.lane.b32.xlu1 %v710_v3, %s1578_s22  ;;  %s1791_s22 = scalar_lea.hbm %s1837_s4, %s1428_s11 }
  0xa2   : > { %957 = vrot.lane.b32.xlu0 %v945_v2, %s1580_s27  ;;  %v1194_v42 = vcombine.high %v1186_v37, %v1186_v37 }
  0xa5   : > { %349 = vrot.lane.b32.xlu1 %v340_v10, %s1579_s23 }
  0xa6   : > { %832 = vrot.lane.b32.xlu0 %v823_v9, %s1577_s20 }
  0xa9   : > { %470 = vrot.lane.b32.xlu1 %v461_v12, %s1581_s30 }
  0xaa   : > { %834 = vrot.lane.b32.xlu0 %v831_v13, %s1577_s20 }
  0xad   : > { %351 = vrot.lane.b32.xlu1 %v348_v17, %s1579_s23  ;;  %s1299_s23 = scalar_lea.sflag [#allocation5], %s188_s9 }
  0xae   : > { %953 = vrot.lane.b32.xlu0 %v944_v16, %s1580_s27  ;;  %v1413_v16 = vld [vmem:[%s1834_s1 + $0x38] sm:$0xff] }
  0xb1   : > { %955 = vrot.lane.b32.xlu1 %v952_v22, %s1580_s27  ;;  %s1504_s27 = scalar_lea.vmem %s1793_s13, 256 }
  0xb2   : > { %474 = vrot.lane.b32.xlu0 %v462_v21, %s1581_s30  ;;  %p1505_p11 = scmp.ne.s32.totalorder %s1793_s13, %s1504_s27  ;;  %p1512_p1 = scmp.lt.s32.totalorder %s1510_s29, %s1504_s27 }
  0xb4   : > { %p1506_p12 = pnand %p1505_p11, %p1650_p5  ;;  %p1513_p2 = por %p1512_p1, %p1511_p0 }
  0xb5   : > { %472 = vrot.lane.b32.xlu1 %v469_v29, %s1581_s30 }
  0xb6   : > { %1078 = vrot.lane.b32.xlu0 %v1066_v28, %s1582_s5  ;;  %p1507_p13 = pneg %p1506_p12 }
  0xb8   : > { %p1514_p3 = pnand %p1513_p2, %p1507_p13 }
  0xb9   : > { %1076 = vrot.lane.b32.xlu1 %v1073_v33, %s1582_s5 }
  0xba   : > { %1074 = vrot.lane.b32.xlu0 %v1065_v27, %s1582_s5 }
  0xbd   : > { %593 = vrot.lane.b32.xlu1 %v590_v38, %s1584_s6 }
  0xbe   : > { %595 = vrot.lane.b32.xlu0 %v583_v36, %s1584_s6 }
  0xc1   : > { %1197 = vrot.lane.b32.xlu1 %v1194_v42, %s1585_s7 }
  0xc2   : > { %1199 = vrot.lane.b32.xlu0 %v1187_v41, %s1585_s7 }
  0xc5   : > { %591 = vrot.lane.b32.xlu1 %v582_v32, %s1584_s6 }
  0xc6   : > { %1195 = vrot.lane.b32.xlu0 %v1186_v37, %s1585_s7 }
  0xc9   : > { %1291 = vperm.xlu1 %1502, %v1288_v43  }
 0x10b   : > { %v837_v44 = vpop.permute.xlu1 %836 }
 0x10c   : > { %v716_v45 = vpop.permute.xlu0 %715 }
 0x10f   : > { %v712_v46 = vpop.permute.xlu1 %711 }
 0x110   : > { %v354_v47 = vpop.permute.xlu0 %353 }
 0x113   : > { %v714_v48 = vpop.permute.xlu1 %713 }
 0x114   : > { %v958_v49 = vpop.permute.xlu0 %957  ;;  %v719_v50 = vsel %vm717_vm15, %v714_v48, %v716_v45  ;;  %v718_v51 = vsel %vm717_vm15, %v712_v46, %v714_v48 }
 0x115   : > { %1399 = vmatprep.subr.msk.mxu0 %vm239_vm6, %v719_v50 }
 0x116   : > { %1400 = vmatpush1.msk.msra.mxu0 %vm239_vm6, %v718_v51 }
 0x117   : > { %v350_v53 = vpop.permute.xlu1 %349  ;;  %1401 = vmatmul.mubr.msk.f32.vlgmr.msra.gmra.mrb[0].mxu0 %vm235_vm10, %v1398_v52 }
 0x118   : > { %v833_v54 = vpop.permute.xlu0 %832  ;;  %912 = vmatprep.mubr.f32.mxu0 %v1568_v8 }
 0x11b   : > { %v471_v55 = vpop.permute.xlu1 %470 }
 0x11c   : > { %v835_v56 = vpop.permute.xlu0 %834 }
 0x11d   : > { %v839_v57 = vsel %vm838_vm0, %v833_v54, %v835_v56  ;;  %v840_v58 = vsel %vm838_vm0, %v835_v56, %v837_v44 }
 0x11e   : > { %1404 = vmatprep.subr.msk.mxu0 %vm239_vm6, %v840_v58 }
 0x11f   : > { %1405 = vmatpush1.msk.msra.mxu0 %vm239_vm6, %v839_v57  ;;  %v352_v60 = vpop.permute.xlu1 %351 }
 0x120   : > { %v954_v61 = vpop.permute.xlu0 %953  ;;  %1406 = vmatmul.mubr.msk.f32.vlgmr.msra.gmra.mrb[0].mxu0 %vm235_vm10, %v1403_v59  ;;  %v356_v62 = vsel %vm355_vm1, %v350_v53, %v352_v60  ;;  %v357_v63 = vsel %vm355_vm1, %v352_v60, %v354_v47 }
 0x121   : > { %1033 = vmatprep.mubr.f32.mxu0 %v1568_v8  ;;  %1384 = vmatprep.subr.msk.mxu1 %vm239_vm6, %v357_v63 }
 0x122   : > { %1385 = vmatpush1.msk.msra.mxu1 %vm239_vm6, %v356_v62 }
 0x123   : > { %v956_v1 = vpop.permute.xlu1 %955  ;;  %1386 = vmatmul.mubr.msk.f32.vlgmr.msra.gmra.mrb[0].mxu1 %vm235_vm10, %v1383_v0 }
 0x124   : > { %v475_v2 = vpop.permute.xlu0 %474  ;;  %v960_v3 = vsel %vm959_vm2, %v954_v61, %v956_v1  ;;  %v961_v4 = vsel %vm959_vm2, %v956_v1, %v958_v49  ;;  %550 = vmatprep.mubr.f32.mxu1 %v1568_v8 }
 0x125   : > { %1409 = vmatprep.subr.msk.mxu0 %vm239_vm6, %v961_v4 }
 0x126   : > { %1410 = vmatpush1.msk.msra.mxu0 %vm239_vm6, %v960_v3 }
 0x127   : > { %v473_v6 = vpop.permute.xlu1 %472 }
 0x128   : > { %v1079_v7 = vpop.permute.xlu0 %1078  ;;  %1411 = vmatmul.mubr.msk.f32.vlgmr.msra.gmra.mrb[0].mxu0 %vm235_vm10, %v1408_v5  ;;  %v477_v9 = vsel %vm476_vm3, %v471_v55, %v473_v6  ;;  %v478_v10 = vsel %vm476_vm3, %v473_v6, %v475_v2 }
 0x129   : > { %1154 = vmatprep.mubr.f32.mxu0 %v1568_v8  ;;  %1389 = vmatprep.subr.msk.mxu1 %vm239_vm6, %v478_v10 }
 0x12a   : > { %1390 = vmatpush1.msk.msra.mxu1 %vm239_vm6, %v477_v9 }
 0x12b   : > { %v1077_v12 = vpop.permute.xlu1 %1076  ;;  %1391 = vmatmul.mubr.msk.f32.vlgmr.msra.gmra.mrb[0].mxu1 %vm235_vm10, %v1388_v11 }
 0x12c   : > { %v1075_v13 = vpop.permute.xlu0 %1074  ;;  %v1082_v14 = vsel %vm1080_vm4, %v1077_v12, %v1079_v7  ;;  %671 = vmatprep.mubr.f32.mxu1 %v1568_v8 }
 0x12d   : > { %v1081_v15 = vsel %vm1080_vm4, %v1075_v13, %v1077_v12  ;;  %1414 = vmatprep.subr.msk.mxu0 %vm239_vm6, %v1082_v14 }
 0x12e   : > { %1415 = vmatpush1.msk.msra.mxu0 %vm239_vm6, %v1081_v15 }
 0x12f   : > { %v594_v17 = vpop.permute.xlu1 %593 }
 0x130   : > { %v596_v18 = vpop.permute.xlu0 %595  ;;  %1416 = vmatmul.mubr.msk.f32.vlgmr.msra.gmra.mrb[0].mxu0 %vm235_vm10, %v1413_v16 }
 0x131   : > { %v599_v19 = vsel %vm597_vm5, %v594_v17, %v596_v18  ;;  %1275 = vmatprep.mubr.f32.mxu0 %v1568_v8  ;;  %v1418_v8 = vld [vmem:[%s1834_s1 + $0x40] sm:$0xff] }
 0x132   : > { %1394 = vmatprep.subr.msk.mxu1 %vm239_vm6, %v599_v19 }
 0x133   : > { %v1198_v20 = vpop.permute.xlu1 %1197 }
 0x134   : > { %v1200_v21 = vpop.permute.xlu0 %1199 }
 0x135   : > { %v1203_v22 = vsel %vm1201_vm7, %v1198_v20, %v1200_v21 }
 0x136   : > { %1419 = vmatprep.subr.msk.mxu0 %vm239_vm6, %v1203_v22 }
 0x137   : > { %v592_v23 = vpop.permute.xlu1 %591 }
 0x138   : > { %v1196_v24 = vpop.permute.xlu0 %1195  ;;  %v598_v26 = vsel %vm597_vm5, %v592_v23, %v594_v17 }
 0x139   : > { %v1202_v27 = vsel %vm1201_vm7, %v1196_v24, %v1198_v20  ;;  %1395 = vmatpush1.msk.msra.mxu1 %vm239_vm6, %v598_v26 }
 0x13a   : > { %1420 = vmatpush1.msk.msra.mxu0 %vm239_vm6, %v1202_v27  ;;  %1396 = vmatmul.mubr.msk.f32.vlgmr.msra.gmra.mrb[0].mxu1 %vm235_vm10, %v1393_v25 }
 0x13b   : > { %1421 = vmatmul.mubr.msk.f32.vlgmr.msra.gmra.mrb[0].mxu0 %vm235_vm10, %v1418_v8 }
 0x148   : > { %v1292_v28 = vpop.permute.xlu1 %1291 }
 0x20d   : > { %v673_v29 = vpop.f32.mrb[0].mxu1 }
 0x20e   : > { %v1277_v30 = vpop.f32.mrb[0].mxu0  ;;  %v675_v32 = vpop.f32.mrb[1].mxu1 }
 0x20f   : > { %v1429_v31 = vadd.f32 %v1277_v30, %v673_v29  ;;  %v1279_v33 = vpop.f32.mrb[1].mxu0 }
 0x210   : > { %v1430_v34 = vadd.f32 %v1279_v33, %v675_v32 }
 0x211   : > { %v1294_v35 = vadd.f32 %v1429_v31, %v1292_v28 }
 0x212   : > { %v1295_v36 = vadd.f32 %v1430_v34, %v1292_v28 }
 0x213   : > { %1296 = vst [vmem:[%s190_s12] sm:$0xff] %v1294_v35 }
 0x214   : > { %1297 = vst [vmem:[%s190_s12 + $0x8] sm:$0xff] %v1295_v36 }
 0x215   : > { %1517 = shalt.err (!%p1514_p3)
}
 0x216   : > { %s1518_s30 = scalar_lea.hbm %s1791_s22, 256  ;;  %s1522_s7 = scalar_lea.hbm %s1837_s4, 512 }
 0x217   : > { %p1519_p4 = scmp.ne.s32.totalorder %s1791_s22, %s1518_s30  ;;  %p1523_p9 = scmp.lt.u32.totalorder %s1791_s22, %s1837_s4 }
 0x218   : > { %p1524_p10 = scmp.lt.u32.totalorder %s1522_s7, %s1518_s30  ;;  %p1526_p12 = scmp.lt.u32.totalorder %s1518_s30, %s1791_s22 }
 0x219   : > { %p1520_p7 = pnand %p1519_p4, %p1650_p5 }
 0x21a   : > { %p1525_p11 = por %p1524_p10, %p1523_p9 }
 0x21b   : > { %p1521_p8 = pneg %p1520_p7 }
 0x21c   : > { %p1527_p13 = por %p1526_p12, %p1525_p11 }
 0x21e   : > { %p1528_p0 = pnand %p1527_p13, %p1521_p8 }
 0x220   : > { %1531 = shalt.err (!%p1528_p0)
}
 0x221   : > { %1445 = dma.vmem_to_hbm [thread:$0]  (%p1650_p5), %s1793_s13, 256, %s1791_s22, %s1299_s23  }
 0x222 PF: > { %p1451_p1 = scmp.ge.s32.totalorder %s1566_s18, 2  ;;  %s1325_s10 = sand.u32 1, %s1554_s15  }
 0x223   : > { %s1326_s11 = scalar_lea.sflag [#allocation5], %s1325_s10 }
 0x224   : > { %p1448_p2 = pnand %p1451_p1, %p1654_p6 }
 0x226   : > { %1549 = dma.done.wait (!%p1448_p2), %s1326_s11, 256  }
 0x227   : > { %1551 = vsyncadd (!%p1448_p2), %s1326_s11, 4294967040  ;;  %p14_p3 = scmp.ge.s32.totalorder %s1637_s21, 4   ;;  %s1840_s15 = smov %s1558_s16 }
 0x228   : > { %s1841_s16 = smov %s1562_s17  ;;  %s1842_s17 = smov %s1648_s24 }
 0x229   : > { %s1843_s18 = smov %s1637_s21  ;;  %16 = sbr.rel (!%p14_p3) target bundleno = 3 (0x3), region = 87 }
 0x230   :  { %1331 = vsyncpa [#allocation5], 1 }
 0x231   :  { %1333 = vsyncpa [#allocation5 + $0x1], 1 }

</bundles_post_ra>
